<compile_context>
chip_gen: v6e
topology: v6e:2x2x1
jax: 0.10.0
libtpu: 0.0.40
codegen_flags: <defaults>
</compile_context>

<pallas_src>
import functools
import math

import jax
import jax.numpy as jnp
from jax.experimental import pallas as pl
from jax.experimental.pallas import tpu as pltpu


def _binary_kl_kernel(s_ref, t_ref, o_ref, acc_ref, *, inv_temp, scale, eps, log_eps):
    i = pl.program_id(0)

    @pl.when(i == 0)
    def _init():
        acc_ref[0] = jnp.float32(0.0)

    xs = s_ref[...].astype(jnp.float32) * inv_temp
    xt = t_ref[...].astype(jnp.float32) * inv_temp

    # softplus identities: with e = exp(-x), sigmoid(x) = 1/(1+e)
    #   log(sigmoid(x))     = -log1p(e)
    #   log(1 - sigmoid(x)) = -log1p(e) - x
    # -> 2 exp + 2 log1p + 1 approx-recip per (s,t) element pair.
    e_s = jnp.exp(-xs)
    e_t = jnp.exp(-xt)

    log_s = -jnp.log1p(e_s)
    log_1ms = log_s - xs
    log_t = -jnp.log1p(e_t)
    log_1mt = log_t - xt

    # clamp in log space (monotone; equals torch.clamp(p, min=eps) before log).
    # The upper clamp (max=1-eps) is a no-op in f32 since 1-1e-8 rounds to 1.0,
    # and these log values are already <= 0. Keeps everything finite.
    log_s = jnp.maximum(log_s, log_eps)
    log_1ms = jnp.maximum(log_1ms, log_eps)
    log_t = jnp.maximum(log_t, log_eps)
    log_1mt = jnp.maximum(log_1mt, log_eps)

    # teacher probability (sigmoid) on the EUP slot
    t = pl.reciprocal(1.0 + e_t, approx=True)
    t = jnp.clip(t, eps, 1.0 - eps)

    # KLDivLoss(reduction='none')(log_p, q) = q*(log q - log p), summed for the
    # "positive" and "negative" binary channels.
    loss = t * (log_t - log_s) + (1.0 - t) * (log_1mt - log_1ms)

    acc_ref[0] = acc_ref[0] + jnp.sum(loss)

    @pl.when(i == pl.num_programs(0) - 1)
    def _finalize():
        o_ref[0] = acc_ref[0] * scale


def binary_kl_loss(student, teacher, temperature=2.0, eps=1e-8):
    """Pallas TPU implementation of BinaryKL_loss.forward."""
    assert student.shape == teacher.shape
    N = student.shape[0]
    E = int(student.size)

    LANES = 512            # lane-dense width (multiple of 128)
    MAX_TILE_ROWS = 1024   # 1024 x 512 f32 = 2 MiB per input per tile

    rows = -(-E // LANES)
    tile_rows = min(MAX_TILE_ROWS, ((rows + 7) // 8) * 8)
    rows_padded = ((rows + tile_rows - 1) // tile_rows) * tile_rows
    n_tiles = rows_padded // tile_rows
    e_padded = rows_padded * LANES

    # Pad both inputs with identical values (0 == 0) so padded elements
    # contribute exactly 0 to the loss sum.
    s2d = jnp.pad(student.reshape(-1), (0, e_padded - E)).reshape(rows_padded, LANES)
    t2d = jnp.pad(teacher.reshape(-1), (0, e_padded - E)).reshape(rows_padded, LANES)

    kernel = functools.partial(
        _binary_kl_kernel,
        inv_temp=1.0 / float(temperature),
        scale=float(temperature) ** 2 / float(N),
        eps=float(eps),
        log_eps=float(math.log(eps)),
    )

    itemsize = jnp.dtype(student.dtype).itemsize
    cost = pl.CostEstimate(
        flops=12 * e_padded,
        transcendentals=5 * e_padded,
        bytes_accessed=2 * e_padded * itemsize + 4,
    )

    out = pl.pallas_call(
        kernel,
        out_shape=jax.ShapeDtypeStruct((1,), jnp.float32),
        grid=(n_tiles,),
        in_specs=[
            pl.BlockSpec((tile_rows, LANES), lambda i: (i, 0)),
            pl.BlockSpec((tile_rows, LANES), lambda i: (i, 0)),
        ],
        out_specs=pl.BlockSpec(memory_space=pltpu.SMEM),
        scratch_shapes=[pltpu.SMEM((1,), jnp.float32)],
        compiler_params=pltpu.CompilerParams(
            dimension_semantics=("arbitrary",),  # resident scalar accumulator
        ),
        cost_estimate=cost,
    )(s2d, t2d)
    return out[0]


def binary_kl_loss_ref(student, teacher, temperature=2.0, eps=1e-8):
    """Pure-JAX reference matching the PyTorch semantics."""
    N = student.shape[0]
    s = jax.nn.sigmoid(student / temperature)
    t = jax.nn.sigmoid(teacher / temperature)
    s = jnp.clip(s, eps, 1.0 - eps)
    t = jnp.clip(t, eps, 1.0 - eps)
    loss = t * (jnp.log(t) - jnp.log(s)) + (1.0 - t) * (
        jnp.log(1.0 - t) - jnp.log(1.0 - s)
    )
    return (temperature ** 2) * jnp.sum(loss) / N


if __name__ == "__main__":
    key = jax.random.PRNGKey(0)
    k1, k2, k3, k4 = jax.random.split(key, 4)

    # Small shapes consistent with forward(student[N, C], teacher[N, C]).
    N, C = 2, 4
    student = jax.random.normal(k1, (N, C), dtype=jnp.float32)
    teacher = jax.random.normal(k2, (N, C), dtype=jnp.float32)

    out = binary_kl_loss(student, teacher)
    out = jax.block_until_ready(out)
    ref = binary_kl_loss_ref(student, teacher)
    assert jnp.allclose(out, ref, rtol=5e-3, atol=1e-6), (out, ref)

    # Multi-tile sanity check (exercises grid > 1, padding, accumulation).
    N2, C2 = 48, 16384
    s2 = jax.random.normal(k3, (N2, C2), dtype=jnp.float32)
    t2 = jax.random.normal(k4, (N2, C2), dtype=jnp.float32)
    out2 = jax.block_until_ready(binary_kl_loss(s2, t2))
    ref2 = binary_kl_loss_ref(s2, t2)
    assert jnp.allclose(out2, ref2, rtol=5e-3, atol=1e-5), (out2, ref2)

    print("KERNEL_OK")
</pallas_src>

<mosaic_0001>
module attributes {stable_mosaic.version = 11 : i64} {
  func.func @_binary_kl_kernel(%arg0: i32, %arg1: memref<8x512xf32, #tpu.memory_space<vmem>>, %arg2: memref<8x512xf32, #tpu.memory_space<vmem>>, %arg3: memref<1xf32, #tpu.memory_space<smem>>, %arg4: memref<1xf32, #tpu.memory_space<smem>>) attributes {dimension_semantics = [#tpu.dimension_semantics<arbitrary>], iteration_bounds = array<i64: 1>, scalar_prefetch = 0 : i64, scratch_operands = 1 : i64, tpu.core_type = #tpu.core_type<tc>, window_params = [{transform_indices = @transform_0, window_bounds = array<i64: 8, 512>}, {transform_indices = @transform_1, window_bounds = array<i64: 8, 512>}, {transform_indices = @transform_2, window_bounds = array<i64: 1>}]} {
    %c0_i32 = arith.constant 0 : i32
    %0 = arith.cmpi eq, %arg0, %c0_i32 : i32
    %1 = arith.extui %0 : i1 to i32
    %c0_i32_0 = arith.constant 0 : i32
    %2 = arith.cmpi ne, %1, %c0_i32_0 : i32
    scf.if %2 {
      %cst_22 = arith.constant 0.000000e+00 : f32
      %c0_23 = arith.constant 0 : index
      %55 = memref.load %arg4[%c0_23] : memref<1xf32, #tpu.memory_space<smem>>
      memref.store %cst_22, %arg4[%c0_23] : memref<1xf32, #tpu.memory_space<smem>>
    } else {
    }
    %c0 = arith.constant 0 : index
    %c0_1 = arith.constant 0 : index
    %3 = vector.load %arg1[%c0, %c0_1] : memref<8x512xf32, #tpu.memory_space<vmem>>, vector<8x512xf32>
    %cst = arith.constant 5.000000e-01 : f32
    %4 = vector.broadcast %cst : f32 to vector<8x512xf32>
    %5 = arith.mulf %3, %4 : vector<8x512xf32>
    %c0_2 = arith.constant 0 : index
    %c0_3 = arith.constant 0 : index
    %6 = vector.load %arg2[%c0_2, %c0_3] : memref<8x512xf32, #tpu.memory_space<vmem>>, vector<8x512xf32>
    %cst_4 = arith.constant 5.000000e-01 : f32
    %7 = vector.broadcast %cst_4 : f32 to vector<8x512xf32>
    %8 = arith.mulf %6, %7 : vector<8x512xf32>
    %cst_5 = arith.constant 0.000000e+00 : f32
    %9 = vector.broadcast %cst_5 : f32 to vector<8x512xf32>
    %10 = arith.subf %9, %5 : vector<8x512xf32>
    %11 = math.exp %10 : vector<8x512xf32>
    %cst_6 = arith.constant 0.000000e+00 : f32
    %12 = vector.broadcast %cst_6 : f32 to vector<8x512xf32>
    %13 = arith.subf %12, %8 : vector<8x512xf32>
    %14 = math.exp %13 : vector<8x512xf32>
    %15 = math.log1p %11 : vector<8x512xf32>
    %cst_7 = arith.constant 0.000000e+00 : f32
    %16 = vector.broadcast %cst_7 : f32 to vector<8x512xf32>
    %17 = arith.subf %16, %15 : vector<8x512xf32>
    %18 = arith.subf %17, %5 : vector<8x512xf32>
    %19 = math.log1p %14 : vector<8x512xf32>
    %cst_8 = arith.constant 0.000000e+00 : f32
    %20 = vector.broadcast %cst_8 : f32 to vector<8x512xf32>
    %21 = arith.subf %20, %19 : vector<8x512xf32>
    %22 = arith.subf %21, %8 : vector<8x512xf32>
    %cst_9 = arith.constant -18.420681 : f32
    %23 = vector.broadcast %cst_9 : f32 to vector<8x512xf32>
    %24 = arith.maximumf %17, %23 : vector<8x512xf32>
    %cst_10 = arith.constant -18.420681 : f32
    %25 = vector.broadcast %cst_10 : f32 to vector<8x512xf32>
    %26 = arith.maximumf %18, %25 : vector<8x512xf32>
    %cst_11 = arith.constant -18.420681 : f32
    %27 = vector.broadcast %cst_11 : f32 to vector<8x512xf32>
    %28 = arith.maximumf %21, %27 : vector<8x512xf32>
    %cst_12 = arith.constant -18.420681 : f32
    %29 = vector.broadcast %cst_12 : f32 to vector<8x512xf32>
    %30 = arith.maximumf %22, %29 : vector<8x512xf32>
    %cst_13 = arith.constant 1.000000e+00 : f32
    %31 = vector.broadcast %cst_13 : f32 to vector<8x512xf32>
    %32 = arith.addf %31, %14 : vector<8x512xf32>
    %33 = tpu.reciprocal %32 {approx = true} : vector<8x512xf32> -> vector<8x512xf32>
    %cst_14 = arith.constant 9.99999993E-9 : f32
    %cst_15 = arith.constant 1.000000e+00 : f32
    %34 = vector.broadcast %cst_14 : f32 to vector<8x512xf32>
    %35 = arith.maximumf %34, %33 : vector<8x512xf32>
    %36 = vector.broadcast %cst_15 : f32 to vector<8x512xf32>
    %37 = arith.minimumf %36, %35 : vector<8x512xf32>
    %38 = arith.subf %28, %24 : vector<8x512xf32>
    %39 = arith.mulf %37, %38 : vector<8x512xf32>
    %cst_16 = arith.constant 1.000000e+00 : f32
    %40 = vector.broadcast %cst_16 : f32 to vector<8x512xf32>
    %41 = arith.subf %40, %37 : vector<8x512xf32>
    %42 = arith.subf %30, %26 : vector<8x512xf32>
    %43 = arith.mulf %41, %42 : vector<8x512xf32>
    %44 = arith.addf %39, %43 : vector<8x512xf32>
    %c0_17 = arith.constant 0 : index
    %45 = memref.load %arg4[%c0_17] : memref<1xf32, #tpu.memory_space<smem>>
    %46 = vector.shape_cast %44 : vector<8x512xf32> to vector<1x8x512xf32>
    %cst_18 = arith.constant dense<0.000000e+00> : vector<1xf32>
    %47 = vector.multi_reduction <add>, %46, %cst_18 [1, 2] : vector<1x8x512xf32> to vector<1xf32>
    %48 = vector.shape_cast %47 : vector<1xf32> to vector<1x1x1xf32>
    %49 = vector.extract %48[0, 0, 0] : f32 from vector<1x1x1xf32>
    %50 = arith.addf %45, %49 : f32
    %c0_19 = arith.constant 0 : index
    %51 = memref.load %arg4[%c0_19] : memref<1xf32, #tpu.memory_space<smem>>
    memref.store %50, %arg4[%c0_19] : memref<1xf32, #tpu.memory_space<smem>>
    %c0_i32_20 = arith.constant 0 : i32
    %52 = arith.cmpi eq, %arg0, %c0_i32_20 : i32
    %53 = arith.extui %52 : i1 to i32
    %c0_i32_21 = arith.constant 0 : i32
    %54 = arith.cmpi ne, %53, %c0_i32_21 : i32
    scf.if %54 {
      %c0_22 = arith.constant 0 : index
      %55 = memref.load %arg4[%c0_22] : memref<1xf32, #tpu.memory_space<smem>>
      %cst_23 = arith.constant 2.000000e+00 : f32
      %56 = arith.mulf %55, %cst_23 : f32
      %c0_24 = arith.constant 0 : index
      %57 = memref.load %arg3[%c0_24] : memref<1xf32, #tpu.memory_space<smem>>
      memref.store %56, %arg3[%c0_24] : memref<1xf32, #tpu.memory_space<smem>>
    } else {
    }
    return
  }
  func.func @transform_0(%arg0: i32) -> (i32, i32) {
    %c0_i32 = arith.constant 0 : i32
    %c0_i32_0 = arith.constant 0 : i32
    return %arg0, %c0_i32 : i32, i32
  }
  func.func @transform_1(%arg0: i32) -> (i32, i32) {
    %c0_i32 = arith.constant 0 : i32
    %c0_i32_0 = arith.constant 0 : i32
    return %arg0, %c0_i32 : i32, i32
  }
  func.func @transform_2(%arg0: i32) -> i32 {
    %c0_i32 = arith.constant 0 : i32
    %c0_i32_0 = arith.constant 0 : i32
    return %c0_i32 : i32
  }
}

</mosaic_0001>

<bundles_post_ra>
// kernel: tpu_custom_call.1
= control target key start
LH: loop header
LB: loop body
LE: loop exit
PB: predicated region body
PF: predicated region fallthrough
CT: control target
= control target key end

     0   :  { %7 = vsyncpa [#allocation4], 0  ;;  %s488_s0 = inlined_call_operand.hbm [shape: f32[8,512], index: 0, kind: input, shape index: {}]   ;;  %s489_s1 = inlined_call_operand.hbm [shape: f32[8,512], index: 1, kind: input, shape index: {}]   ;;  %s490_s2 = inlined_call_operand.hbm [shape: f32[1], index: 2, kind: output, shape index: {}]  }
   0x1   :  { %8 = vsyncpa [#allocation7], 0 }
   0x2   :  { %9 = vsyncpa [#allocation5], 0  ;;  %s363_s9 = smov [#allocation3]   ;;  %s364_s11 = smov [#allocation6]  }
   0x3   :  { %s16_s10 = sshll.u32 %s363_s9, 4  ;;  %s26_s12 = sshll.u32 %s364_s11, 4  ;;  %s17_s10 = int_to_ptr.vmem [resolvable:$true] %s16_s10  ;;  %s27_s12 = int_to_ptr.vmem [resolvable:$true] %s26_s12 }
   0x4   :  { %s317_s13 = scalar_lea.vmem %s17_s10, 512  ;;  %p322_p1 = scmp.lt.s32.totalorder %s17_s10, %s17_s10 }
   0x5   :  { %p318_p0 = scmp.ne.s32.totalorder %s17_s10, %s317_s13  ;;  %p323_p2 = scmp.lt.s32.totalorder %s317_s13, %s317_s13 }
   0x7   :  { %p324_p3 = por %p323_p2, %p322_p1 }
   0x9   :  { %p325_p4 = pnand %p324_p3, %p318_p0 }
   0xb   :  { %328 = shalt.err (!%p325_p4)
}
   0xc   :  { %19 = dma.hbm_to_vmem [thread:$0]  %s488_s0, 512, %s17_s10, [#allocation4]  }
   0xd   :  { %s337_s16 = scalar_lea.vmem %s27_s12, 512  ;;  %p342_p6 = scmp.lt.s32.totalorder %s27_s12, %s27_s12 }
   0xe   :  { %p338_p5 = scmp.ne.s32.totalorder %s27_s12, %s337_s16  ;;  %p343_p7 = scmp.lt.s32.totalorder %s337_s16, %s337_s16 }
  0x10   :  { %p344_p8 = por %p343_p7, %p342_p6 }
  0x12   :  { %p345_p9 = pnand %p344_p8, %p338_p5 }
  0x14   :  { %348 = shalt.err (!%p345_p9)
}
  0x15   :  { %29 = dma.hbm_to_vmem [thread:$0]  %s489_s1, 512, %s27_s12, [#allocation7]  }
  0x16   :  { %357 = dma.done.wait [#allocation4], 512  }
  0x17   :  { %358 = vsyncadd [#allocation4], 4294966784 }
  0x18   :  { %359 = dma.done.wait [#allocation7], 512  }
  0x19   :  { %360 = vsyncadd [#allocation7], 4294966784  ;;  %v42_v0 = vld [vmem:[#allocation3] sm:$0xff]  ;;  %v43_v1 = vld [vmem:[#allocation3 + $0x8] sm:$0xff]  ;;  %s365_s19 = smov [#allocation8]  }
  0x1a   :  { %v44_v2 = vld [vmem:[#allocation3 + $0x10] sm:$0xff]  ;;  %v45_v3 = vld [vmem:[#allocation3 + $0x18] sm:$0xff]  ;;  %v387_v4 = vmul.f32 0.5, %v42_v0  ;;  %v389_v5 = vmul.f32 0.5, %v43_v1  ;;  %v50_v7 = vld [vmem:[#allocation6] sm:$0xff] }
  0x1b   :  { %v391_v6 = vmul.f32 0.5, %v44_v2  ;;  %v51_v8 = vld [vmem:[#allocation6 + $0x8] sm:$0xff]  ;;  %v393_v9 = vmul.f32 0.5, %v45_v3  ;;  %v52_v10 = vld [vmem:[#allocation6 + $0x10] sm:$0xff]  ;;  %v53_v11 = vld [vmem:[#allocation6 + $0x18] sm:$0xff]  ;;  %v395_v12 = vmul.f32 0.5, %v50_v7 }
  0x1c   :  { %v397_v13 = vmul.f32 0.5, %v51_v8  ;;  %v399_v14 = vmul.f32 0.5, %v52_v10  ;;  %v58_v15 = vsub.f32 0.0, %v387_v4  ;;  %v59_v16 = vsub.f32 0.0, %v389_v5 }
  0x1d   :  { %v403_v17 = vmul.f32 0.5, %v53_v11  ;;  %v60_v18 = vsub.f32 0.0, %v391_v6  ;;  %v61_v19 = vsub.f32 0.0, %v393_v9  ;;  %v70_v20 = vsub.f32 0.0, %v395_v12 }
  0x1e   :  { %v62_v21 = vmul.f32 1.442695, %v58_v15  ;;  %v64_v22 = vmul.f32 1.442695, %v59_v16  ;;  %v71_v23 = vsub.f32 0.0, %v397_v13  ;;  %v72_v26 = vsub.f32 0.0, %v399_v14 }
  0x1f   :  { %v66_v24 = vmul.f32 1.442695, %v60_v18  ;;  %v68_v25 = vmul.f32 1.442695, %v61_v19  ;;  %v74_v27 = vmul.f32 1.442695, %v70_v20 }
  0x20   :  { %269 = vpow2.f32 %v62_v21  ;;  %v73_v28 = vsub.f32 0.0, %v403_v17  ;;  %v76_v29 = vmul.f32 1.442695, %v71_v23  ;;  %v78_v30 = vmul.f32 1.442695, %v72_v26 }
  0x21   :  { %271 = vpow2.f32 %v64_v22 }
  0x22   :  { %273 = vpow2.f32 %v66_v24  ;;  %v80_v31 = vmul.f32 1.442695, %v73_v28 }
  0x23   :  { %275 = vpow2.f32 %v68_v25 }
  0x24   :  { %277 = vpow2.f32 %v74_v27 }
  0x25   :  { %279 = vpow2.f32 %v76_v29 }
  0x26   :  { %281 = vpow2.f32 %v78_v30 }
  0x27   :  { %283 = vpow2.f32 %v80_v31 }
  0x2d   :  { %v270_v32 = vpop.eup %269 }
  0x2e   :  { %v272_v33 = vpop.eup %271  ;;  %v82_v34 = vadd.f32 1.0, %v270_v32  ;;  %v85_v40 = vmul.f32 -0.5, %v270_v32  ;;  %v88_v47 = vand.u32 2147483647, %v270_v32 }
  0x2f   :  { %v274_v35 = vpop.eup %273  ;;  %v91_v36 = vadd.f32 1.0, %v272_v33  ;;  %v94_v43 = vmul.f32 -0.5, %v272_v33  ;;  %v97_v51 = vand.u32 2147483647, %v272_v33 }
  0x30   :  { %v276_v37 = vpop.eup %275  ;;  %285 = vlog2.f32 %v82_v34  ;;  %v100_v38 = vadd.f32 1.0, %v274_v35  ;;  %v103_v45 = vmul.f32 -0.5, %v274_v35  ;;  %v86_v50 = vadd.f32 1.0, %v85_v40 }
  0x31   :  { %v278_v39 = vpop.eup %277  ;;  %287 = vlog2.f32 %v91_v36  ;;  %v109_v41 = vadd.f32 1.0, %v276_v37  ;;  %v112_v48 = vmul.f32 -0.5, %v276_v37  ;;  %v95_v53 = vadd.f32 1.0, %v94_v43 }
  0x32   :  { %289 = vlog2.f32 %v100_v38  ;;  %v411_v42 = vpop.eup %279  ;;  %v126_v46 = vadd.f32 1.0, %v278_v39  ;;  %v106_v54 = vand.u32 2147483647, %v274_v35  ;;  %v104_v56 = vadd.f32 1.0, %v103_v45 }
  0x33   :  { %v413_v44 = vpop.eup %281  ;;  %291 = vlog2.f32 %v109_v41  ;;  %v135_v52 = vadd.f32 1.0, %v411_v42  ;;  %v115_v57 = vand.u32 2147483647, %v276_v37  ;;  %v129_v58 = vmul.f32 -0.5, %v278_v39 }
  0x34   :  { %v415_v49 = vpop.eup %283  ;;  %293 = vlog2.f32 %v126_v46  ;;  %v144_v55 = vadd.f32 1.0, %v413_v44  ;;  %vm419_vm0 = vcmp.lt.f32.partialorder %v88_v47, 0.0004427343  ;;  %v113_v60 = vadd.f32 1.0, %v112_v48 }
  0x35   :  { %295 = vlog2.f32 %v135_v52  ;;  %v153_v61 = vadd.f32 1.0, %v415_v49  ;;  %v87_v62 = vmul.f32 %v270_v32, %v86_v50  ;;  %vm424_vm1 = vcmp.lt.f32.partialorder %v97_v51, 0.0004427343 }
  0x36   :  { %297 = vlog2.f32 %v144_v55  ;;  %v132_v0 = vand.u32 2147483647, %v278_v39  ;;  %v138_v1 = vmul.f32 -0.5, %v411_v42  ;;  %v96_v2 = vmul.f32 %v272_v33, %v95_v53 }
  0x37   :  { %vm429_vm2 = vcmp.lt.f32.partialorder %v106_v54, 0.0004427343  ;;  %v147_v7 = vmul.f32 -0.5, %v413_v44  ;;  %299 = vlog2.f32 %v153_v61  ;;  %v105_v8 = vmul.f32 %v274_v35, %v104_v56 }
  0x38   :  { %vm434_vm3 = vcmp.lt.f32.partialorder %v115_v57, 0.0004427343  ;;  %v130_v11 = vadd.f32 1.0, %v129_v58  ;;  %301 = vrcp.f32 %v126_v46  ;;  %v114_v16 = vmul.f32 %v276_v37, %v113_v60 }
  0x39   :  { %v141_v18 = vand.u32 2147483647, %v411_v42  ;;  %v156_v19 = vmul.f32 -0.5, %v415_v49  ;;  %303 = vrcp.f32 %v135_v52  ;;  %vm440_vm4 = vcmp.lt.f32.partialorder %v132_v0, 0.0004427343 }
  0x3a   :  { %v139_v23 = vadd.f32 1.0, %v138_v1  ;;  %305 = vrcp.f32 %v144_v55  ;;  %v148_v26 = vadd.f32 1.0, %v147_v7  ;;  %v150_v27 = vand.u32 2147483647, %v413_v44 }
  0x3b   :  { %307 = vrcp.f32 %v153_v61  ;;  %v131_v30 = vmul.f32 %v278_v39, %v130_v11  ;;  %v159_v31 = vand.u32 2147483647, %v415_v49  ;;  %vm450_vm5 = vcmp.lt.f32.partialorder %v141_v18, 0.0004427343 }
  0x3c   :  { %v157_v36 = vadd.f32 1.0, %v156_v19  ;;  %v140_v41 = vmul.f32 %v411_v42, %v139_v23  ;;  %v149_v46 = vmul.f32 %v413_v44, %v148_v26  ;;  %vm459_vm6 = vcmp.lt.f32.partialorder %v150_v27, 0.0004427343 }
  0x3d   :  { %v286_v15 = vpop.eup %285  ;;  %vm466_vm7 = vcmp.lt.f32.partialorder %v159_v31, 0.0004427343 }
  0x3e   :  { %v288_v20 = vpop.eup %287  ;;  %v84_v21 = vmul.f32 0.6931472, %v286_v15  ;;  %v158_v44 = vmul.f32 %v415_v49, %v157_v36 }
  0x3f   :  { %v290_v24 = vpop.eup %289  ;;  %v93_v25 = vmul.f32 0.6931472, %v288_v20 }
  0x40   :  { %v90_v28 = vsel %vm419_vm0, %v87_v62, %v84_v21  ;;  %v102_v29 = vmul.f32 0.6931472, %v290_v24  ;;  %v292_v32 = vpop.eup %291 }
  0x41   :  { %v99_v33 = vsel %vm424_vm1, %v96_v2, %v93_v25  ;;  %v118_v34 = vsub.f32 0.0, %v90_v28  ;;  %v111_v38 = vmul.f32 0.6931472, %v292_v32  ;;  %v294_v39 = vpop.eup %293 }
  0x42   :  { %v108_v37 = vsel %vm429_vm2, %v105_v8, %v102_v29  ;;  %v119_v40 = vsub.f32 0.0, %v99_v33  ;;  %v128_v51 = vmul.f32 0.6931472, %v294_v39  ;;  %v296_v42 = vpop.eup %295 }
  0x43   :  { %v120_v43 = vsub.f32 0.0, %v108_v37  ;;  %v122_v45 = vsub.f32 %v118_v34, %v387_v4  ;;  %v117_v48 = vsel %vm434_vm3, %v114_v16, %v111_v38  ;;  %v170_v54 = vmax.f32 %v118_v34, -18.420681  ;;  %v298_v55 = vpop.eup %297 }
  0x44   :  { %v123_v50 = vsub.f32 %v119_v40, %v389_v5  ;;  %v121_v53 = vsub.f32 0.0, %v117_v48  ;;  %v134_v56 = vsel %vm440_vm4, %v131_v30, %v128_v51  ;;  %v137_v57 = vmul.f32 0.6931472, %v296_v42  ;;  %v300_v63 = vpop.eup %299 }
  0x45   :  { %v124_v4 = vsub.f32 %v120_v43, %v391_v6  ;;  %v171_v58 = vmax.f32 %v119_v40, -18.420681  ;;  %v172_v59 = vmax.f32 %v120_v43, -18.420681  ;;  %v146_v60 = vmul.f32 0.6931472, %v298_v55  ;;  %v302_v2 = vpop.eup %301 }
  0x46   :  { %v125_v5 = vsub.f32 %v121_v53, %v393_v9  ;;  %v162_v61 = vsub.f32 0.0, %v134_v56  ;;  %v174_v62 = vmax.f32 %v122_v45, -18.420681  ;;  %v143_v0 = vsel %vm450_vm5, %v140_v41, %v137_v57  ;;  %v304_v11 = vpop.eup %303 }
  0x47   :  { %v173_v6 = vmax.f32 %v121_v53, -18.420681  ;;  %v175_v1 = vmax.f32 %v123_v50, -18.420681  ;;  %v176_v49 = vmax.f32 %v124_v4, -18.420681  ;;  %v152_v3 = vsel %vm459_vm6, %v149_v46, %v146_v60  ;;  %v306_v18 = vpop.eup %305 }
  0x48   :  { %v155_v7 = vmul.f32 0.6931472, %v300_v63  ;;  %v163_v8 = vsub.f32 0.0, %v143_v0  ;;  %v166_v10 = vsub.f32 %v162_v61, %v395_v12  ;;  %v164_v9 = vsub.f32 0.0, %v152_v3  ;;  %v308_v23 = vpop.eup %307 }
  0x49   :  { %v177_v15 = vmax.f32 %v125_v5, -18.420681  ;;  %v178_v16 = vmax.f32 %v162_v61, -18.420681  ;;  %v194_v27 = vmax.f32 %v302_v2, 1e-08 }
  0x4a   :  { %v161_v19 = vsel %vm466_vm7, %v158_v44, %v155_v7  ;;  %v167_v20 = vsub.f32 %v163_v8, %v397_v13  ;;  %v179_v21 = vmax.f32 %v163_v8, -18.420681  ;;  %v182_v22 = vmax.f32 %v166_v10, -18.420681 }
  0x4b   :  { %v165_v24 = vsub.f32 0.0, %v161_v19  ;;  %v168_v25 = vsub.f32 %v164_v9, %v399_v14  ;;  %v180_v26 = vmax.f32 %v164_v9, -18.420681  ;;  %v195_v12 = vmax.f32 %v304_v11, 1e-08 }
  0x4c   :  { %v183_v28 = vmax.f32 %v167_v20, -18.420681  ;;  %v196_v29 = vmax.f32 %v306_v18, 1e-08  ;;  %v202_v30 = vsub.f32 %v178_v16, %v170_v54  ;;  %v197_v34 = vmax.f32 %v308_v23, 1e-08 }
  0x4d   :  { %v169_v31 = vsub.f32 %v165_v24, %v403_v17  ;;  %v181_v32 = vmax.f32 %v165_v24, -18.420681  ;;  %v184_v33 = vmax.f32 %v168_v25, -18.420681  ;;  %v198_v35 = vmin.f32 %v194_v27, 1.0 }
  0x4e   :  { %v199_v36 = vmin.f32 %v195_v12, 1.0  ;;  %v200_v13 = vmin.f32 %v196_v29, 1.0  ;;  %v203_v37 = vsub.f32 %v179_v21, %v171_v58  ;;  %v201_v40 = vmin.f32 %v197_v34, 1.0 }
  0x4f   :  { %v185_v38 = vmax.f32 %v169_v31, -18.420681  ;;  %v204_v41 = vsub.f32 %v180_v26, %v172_v59  ;;  %v205_v39 = vsub.f32 %v181_v32, %v173_v6  ;;  %v206_v14 = vmul.f32 %v202_v30, %v198_v35 }
  0x50   :  { %v210_v43 = vsub.f32 1.0, %v198_v35  ;;  %v211_v45 = vsub.f32 1.0, %v199_v36  ;;  %v207_v46 = vmul.f32 %v203_v37, %v199_v36  ;;  %v212_v48 = vsub.f32 1.0, %v200_v13 }
  0x51   :  { %v208_v47 = vmul.f32 %v204_v41, %v200_v13  ;;  %v213_v50 = vsub.f32 1.0, %v201_v40  ;;  %v214_v51 = vsub.f32 %v182_v22, %v174_v62  ;;  %v215_v17 = vsub.f32 %v183_v28, %v175_v1 }
  0x52   :  { %v216_v52 = vsub.f32 %v184_v33, %v176_v49  ;;  %v217_v42 = vsub.f32 %v185_v38, %v177_v15  ;;  %v209_v53 = vmul.f32 %v205_v39, %v201_v40 }
  0x53   :  { %v218_v4 = vmul.f32 %v214_v51, %v210_v43  ;;  %v219_v44 = vmul.f32 %v215_v17, %v211_v45 }
  0x54   :  { %v220_v54 = vmul.f32 %v216_v52, %v212_v48  ;;  %v221_v55 = vmul.f32 %v217_v42, %v213_v50 }
  0x55   :  { %v222_v56 = vadd.f32 %v218_v4, %v206_v14  ;;  %v223_v57 = vadd.f32 %v219_v44, %v207_v46 }
  0x56   :  { %v224_v58 = vadd.f32 %v220_v54, %v208_v47  ;;  %v225_v59 = vadd.f32 %v221_v55, %v209_v53 }
  0x57   :  { %v227_v5 = vadd.f32 %v223_v57, %v222_v56 }
  0x59   :  { %v228_v60 = vadd.f32 %v227_v5, %v224_v58 }
  0x5b   :  { %v229_v61 = vadd.f32 %v228_v60, %v225_v59 }
  0x5d   :  { %230 = vadd.xlane.f32.xlu0 %v229_v61 }
  0xe6   :  { %v231_v63 = vpop.xlane.xlu0 %230 }
  0xe7   :  { %v232_v0 = vrot.slane %v231_v63, 4 }
  0xe9   :  { %v233_v6 = vadd.f32 %v232_v0, %v231_v63 }
  0xeb   :  { %v234_v62 = vrot.slane %v233_v6, 2 }
  0xed   :  { %v235_v1 = vadd.f32 %v234_v62, %v233_v6 }
  0xef   :  { %v236_v49 = vrot.slane %v235_v1, 1 }
  0xf1   :  { %v237_v2 = vadd.f32 %v236_v49, %v235_v1 }
  0xf3   :  { %264 = vpush %v237_v2 }
 0x124   :  { %s265_s0 = spop %264 }
 0x125   :  { %s246_s1 = smul.f32 2.0, %s265_s0 }
 0x127   :  { %248 = sst [smem:[#allocation8]] %s246_s1 }
 0x128   :  { %256 = dma.smem_to_hbm %s365_s19, 16, %s490_s2, [#allocation5]  }
 0x129   :  { %361 = dma.done.wait [#allocation5], 16  }
 0x12a   :  { %362 = vsyncadd [#allocation5], 4294967280 }
 0x12b   :  { %260 = sfence }
 0x12c   :  { %261 = vsyncpa [#allocation4], 1 }
 0x12d   :  { %262 = vsyncpa [#allocation7], 1 }
 0x12e   :  { %263 = vsyncpa [#allocation5], 1 }

</bundles_post_ra>
